<compile_context>
chip_gen: v6e
topology: v6e:2x2x1
jax: 0.10.0
libtpu: 0.0.40
codegen_flags: <defaults>
</compile_context>

<pallas_src>
import functools

import jax
import jax.numpy as jnp
from jax.experimental import pallas as pl
from jax.experimental.pallas import tpu as pltpu


def _round_up(x, m):
    return ((x + m - 1) // m) * m


def residual_block_kernel(x_ref, xres_ref, wt_ref, b_ref, o_ref):
    # x_ref    : (TM, F)   bf16 input rows (full feature width -> MXU LHS)
    # xres_ref : (TM, TN)  f32 residual slice matching this output block
    # wt_ref   : (F, TN)   bf16 transposed-weight column block (MXU RHS)
    # b_ref    : (1, TN)   f32 bias slice
    # o_ref    : (TM, TN)  output tile
    y = jnp.dot(x_ref[...], wt_ref[...], preferred_element_type=jnp.float32)
    y = y + b_ref[...] + xres_ref[...]          # bias + identity shortcut (f32)
    o_ref[...] = jnp.maximum(y, 0.0).astype(o_ref.dtype)


def prepare_params(weight, bias):
    """Hoist transpose / dtype cast out of the per-call path (do once).

    weight: (F, F) PyTorch (out, in) convention.  bias: (F,).
    Returns (W^T as bf16 (in, out), bias as (1, F) f32)."""
    w_t = jnp.asarray(weight, jnp.float32).T.astype(jnp.bfloat16)
    b2d = jnp.asarray(bias, jnp.float32).reshape(1, -1)
    return w_t, b2d


def _pick_tn(F, budget_bytes=16 * 1024 * 1024):
    """Column-tile the weight so its double-buffered bf16 block fits a VMEM
    budget that is safe even on v7x (64 MiB physical, 32 MiB default scoped)."""
    if 2 * F * F * 2 <= budget_bytes:
        return F
    for tn in (1024, 512, 256, 128):
        if F % tn == 0 and 2 * F * tn * 2 <= budget_bytes:
            return tn
    return 128


@functools.partial(jax.jit, static_argnames=("tm",))
def residual_block(x, w_t_bf16, b2d, *, tm=512):
    """relu(x @ W^T + b + x).

    x: (B, F) f32.  w_t_bf16: (F, F) bf16 (already transposed, (in, out)).
    b2d: (1, F) f32."""
    B, F = x.shape
    # TODO(synk): for F not a multiple of 128, pad the feature axis as well.
    assert F % 128 == 0, "feature dim must be a multiple of the 128-lane width"
    assert w_t_bf16.shape == (F, F) and b2d.shape == (1, F)

    # Row tile: large to amortize per-step overhead, but no larger than the
    # (8-aligned) batch so small batches don't pad excessively.
    tm = min(tm, _round_up(B, 8))
    B_pad = _round_up(B, tm)
    if B_pad != B:
        x = jnp.pad(x, ((0, B_pad - B), (0, 0)))

    tn = _pick_tn(F)
    grid = (B_pad // tm, F // tn)

    x_bf16 = x.astype(jnp.bfloat16)

    cost = pl.CostEstimate(
        flops=2 * B_pad * F * F,
        transcendentals=0,
        bytes_accessed=(B_pad * F * 2            # bf16 x (MXU lhs)
                        + B_pad * F * 4          # f32 residual read
                        + grid[0] * F * F * 2    # bf16 weight (re-read per row tile)
                        + F * 4                  # bias
                        + B_pad * F * 4),        # f32 output
    )

    out = pl.pallas_call(
        residual_block_kernel,
        out_shape=jax.ShapeDtypeStruct((B_pad, F), x.dtype),
        grid_spec=pltpu.PrefetchScalarGridSpec(
            num_scalar_prefetch=0,
            grid=grid,
            in_specs=[
                pl.BlockSpec((tm, F), lambda i, j: (i, 0)),    # x bf16 (matmul LHS)
                pl.BlockSpec((tm, tn), lambda i, j: (i, j)),   # x f32 residual slice
                pl.BlockSpec((F, tn), lambda i, j: (0, j)),    # W^T column block
                pl.BlockSpec((1, tn), lambda i, j: (0, j)),    # bias slice
            ],
            out_specs=pl.BlockSpec((tm, tn), lambda i, j: (i, j)),
        ),
        compiler_params=pltpu.CompilerParams(
            # Both grid axes are independent -> megacore-shardable on v7x.
            dimension_semantics=("parallel", "parallel"),
            # NOTE: for very large F / tm, raise vmem_limit_bytes here
            # (default scoped limit is 32 MiB); unnecessary at these sizes.
        ),
        cost_estimate=cost,
    )(x_bf16, x, w_t_bf16, b2d)

    return out[:B] if B_pad != B else out


def residual_block_ref(x, weight, bias):
    """Pure-JAX f32 reference matching the PyTorch module."""
    y = x @ weight.T + bias
    return jnp.maximum(y + x, 0.0)


if __name__ == "__main__":
    key = jax.random.PRNGKey(0)
    kx, kw, kb = jax.random.split(key, 3)

    B = 16            # batch
    F = 128           # n_features

    x = jax.random.normal(kx, (B, F), dtype=jnp.float32)

    # Deterministic synthetic parameters, PyTorch-Linear-like init:
    # U(-1/sqrt(F), 1/sqrt(F)) for both weight (out, in) and bias.
    bound = 1.0 / jnp.sqrt(jnp.float32(F))
    weight = jax.random.uniform(kw, (F, F), dtype=jnp.float32,
                                minval=-bound, maxval=bound)
    bias = jax.random.uniform(kb, (F,), dtype=jnp.float32,
                              minval=-bound, maxval=bound)

    # One-time parameter prep (transpose + bf16 cast hoisted out of the call).
    w_t_bf16, b2d = prepare_params(weight, bias)

    out = residual_block(x, w_t_bf16, b2d)
    out = jax.block_until_ready(out)

    ref = residual_block_ref(x, weight, bias)
    assert out.shape == (B, F)
    # bf16 MXU operands with f32 accumulation: loosen tolerance vs pure-f32 ref.
    assert jnp.allclose(out, ref, atol=3e-2, rtol=0.0), "mismatch vs reference"

    print("KERNEL_OK")
</pallas_src>

<mosaic_0001>
module attributes {stable_mosaic.version = 11 : i64} {
  func.func @residual_block_kernel(%arg0: i32, %arg1: i32, %arg2: memref<16x128xbf16, #tpu.memory_space<vmem>>, %arg3: memref<16x128xf32, #tpu.memory_space<vmem>>, %arg4: memref<128x128xbf16, #tpu.memory_space<vmem>>, %arg5: memref<1x128xf32, #tpu.memory_space<vmem>>, %arg6: memref<16x128xf32, #tpu.memory_space<vmem>>) attributes {dimension_semantics = [#tpu.dimension_semantics<parallel>, #tpu.dimension_semantics<parallel>], iteration_bounds = array<i64: 1, 1>, scalar_prefetch = 0 : i64, scratch_operands = 0 : i64, tpu.core_type = #tpu.core_type<tc>, window_params = [{transform_indices = @transform_0, window_bounds = array<i64: 16, 128>}, {transform_indices = @transform_1, window_bounds = array<i64: 16, 128>}, {transform_indices = @transform_2, window_bounds = array<i64: 128, 128>}, {transform_indices = @transform_3, window_bounds = array<i64: 1, 128>}, {transform_indices = @transform_4, window_bounds = array<i64: 16, 128>}]} {
    %c0 = arith.constant 0 : index
    %c0_0 = arith.constant 0 : index
    %0 = vector.load %arg2[%c0, %c0_0] : memref<16x128xbf16, #tpu.memory_space<vmem>>, vector<16x128xbf16>
    %c0_1 = arith.constant 0 : index
    %c0_2 = arith.constant 0 : index
    %1 = vector.load %arg4[%c0_1, %c0_2] : memref<128x128xbf16, #tpu.memory_space<vmem>>, vector<128x128xbf16>
    %cst = arith.constant dense<0.000000e+00> : vector<16x128xf32>
    %2 = tpu.matmul %0, %1, %cst {dimension_numbers = #tpu.dot_dimension_numbers<[1], [0], [0], [1], [0, 0, 1, 1], [], []>} : vector<16x128xbf16>, vector<128x128xbf16>, vector<16x128xf32> -> vector<16x128xf32>
    %c0_3 = arith.constant 0 : index
    %c0_4 = arith.constant 0 : index
    %3 = vector.load %arg5[%c0_3, %c0_4] : memref<1x128xf32, #tpu.memory_space<vmem>>, vector<1x128xf32>
    %4 = vector.broadcast %3 : vector<1x128xf32> to vector<16x128xf32>
    %5 = arith.addf %2, %4 : vector<16x128xf32>
    %c0_5 = arith.constant 0 : index
    %c0_6 = arith.constant 0 : index
    %6 = vector.load %arg3[%c0_5, %c0_6] : memref<16x128xf32, #tpu.memory_space<vmem>>, vector<16x128xf32>
    %7 = arith.addf %5, %6 : vector<16x128xf32>
    %cst_7 = arith.constant 0.000000e+00 : f32
    %8 = vector.broadcast %cst_7 : f32 to vector<16x128xf32>
    %9 = arith.maximumf %7, %8 : vector<16x128xf32>
    %c0_8 = arith.constant 0 : index
    %c0_9 = arith.constant 0 : index
    %10 = vector.load %arg6[%c0_8, %c0_9] : memref<16x128xf32, #tpu.memory_space<vmem>>, vector<16x128xf32>
    tpu.vector_store %arg6[%c0_8, %c0_9], %9 {strides = array<i32>} : memref<16x128xf32, #tpu.memory_space<vmem>>, vector<16x128xf32>,
    return
  }
  func.func @transform_0(%arg0: i32, %arg1: i32) -> (i32, i32) {
    %c0_i32 = arith.constant 0 : i32
    %c0_i32_0 = arith.constant 0 : i32
    return %arg0, %c0_i32 : i32, i32
  }
  func.func @transform_1(%arg0: i32, %arg1: i32) -> (i32, i32) {
    %c0_i32 = arith.constant 0 : i32
    return %arg0, %arg1 : i32, i32
  }
  func.func @transform_2(%arg0: i32, %arg1: i32) -> (i32, i32) {
    %c0_i32 = arith.constant 0 : i32
    %c0_i32_0 = arith.constant 0 : i32
    return %c0_i32, %arg1 : i32, i32
  }
  func.func @transform_3(%arg0: i32, %arg1: i32) -> (i32, i32) {
    %c0_i32 = arith.constant 0 : i32
    %c0_i32_0 = arith.constant 0 : i32
    return %c0_i32, %arg1 : i32, i32
  }
  func.func @transform_4(%arg0: i32, %arg1: i32) -> (i32, i32) {
    %c0_i32 = arith.constant 0 : i32
    return %arg0, %arg1 : i32, i32
  }
}

</mosaic_0001>

<bundles_post_ra>
// kernel: residual_block.1
= control target key start
LH: loop header
LB: loop body
LE: loop exit
PB: predicated region body
PF: predicated region fallthrough
CT: control target
= control target key end

     0   :  { %9 = vsyncpa [#allocation3], 0  ;;  %s329_s0 = inlined_call_operand.vmem [shape: bf16[16,128], index: 0, kind: input, shape index: {}]   ;;  %s330_s1 = inlined_call_operand.vmem [shape: f32[16,128], index: 1, kind: input, shape index: {}]   ;;  %s331_s2 = inlined_call_operand.hbm [shape: bf16[128,128], index: 2, kind: input, shape index: {}]   ;;  %s332_s3 = inlined_call_operand.vmem [shape: f32[1,128], index: 3, kind: input, shape index: {}]   ;;  %s333_s4 = inlined_call_operand.hbm [shape: f32[16,128], index: 4, kind: output, shape index: {}]  }
   0x1   :  { %10 = vsyncpa [#allocation4], 0  ;;  %s278_s15 = smov [#allocation2]  }
   0x2   :  { %s20_s16 = sshll.u32 %s278_s15, 4  ;;  %s21_s16 = int_to_ptr.vmem [resolvable:$true] %s20_s16 }
   0x3   :  { %s242_s17 = scalar_lea.vmem %s21_s16, 1024  ;;  %p247_p1 = scmp.lt.s32.totalorder %s21_s16, %s21_s16 }
   0x4   :  { %p243_p0 = scmp.ne.s32.totalorder %s21_s16, %s242_s17  ;;  %p248_p2 = scmp.lt.s32.totalorder %s242_s17, %s242_s17 }
   0x6   :  { %p249_p3 = por %p248_p2, %p247_p1 }
   0x8   :  { %p250_p4 = pnand %p249_p3, %p243_p0 }
   0xa   :  { %253 = shalt.err (!%p250_p4)
}
   0xb   :  { %s279_s18 = smov 64   ;;  %s280_s19 = smov 4  }
   0xc   :  { %26 = dma.hbm_to_vmem [thread:$0]  %s331_s2, 1024, %s21_s16, [#allocation3], %s279_s18, %s279_s18, %s280_s19  }
   0xd   :  { %274 = dma.done.wait [#allocation3], 1024  }
   0xe   :  { %275 = vsyncadd [#allocation3], 4294966272  ;;  %v281_v0 = vmov 0.0   ;;  %vm282_vm0 = vmmov 0   ;;  %v225_v1 = vld [vmem:[#allocation2 + $0x38] sm:$0xff]   ;;  %v226_v2 = vld [vmem:[#allocation2 + $0x30] sm:$0xff]  }
   0xf   :  { %197 = vmatprep.subr.bf16.mxu0 %v281_v0  ;;  %213 = vmatprep.mubr.msk.bf16.mxu0 %vm282_vm0, %v281_v0  ;;  %v227_v3 = vld [vmem:[#allocation2 + $0x28] sm:$0xff]   ;;  %v228_v4 = vld [vmem:[#allocation2 + $0x20] sm:$0xff]   ;;  %v229_v5 = vld [vmem:[#allocation2 + $0x18] sm:$0xff]  }
  0x10   :  { %198 = vmatpush3.bf16.msra.mxu0 %v225_v1  ;;  %v230_v6 = vld [vmem:[#allocation2 + $0x10] sm:$0xff]   ;;  %v231_v7 = vld [vmem:[#allocation2 + $0x8] sm:$0xff]   ;;  %v232_v8 = vld [vmem:[#allocation2] sm:$0xff]  }
  0x11   :  { %199 = vmatprep.subr.bf16.mxu0 %v281_v0  ;;  %v233_v9 = vld [vmem:[%s329_s0] sm:$0xff]   ;;  %v154_v17 = vld [vmem:[%s330_s1 + $0x8] sm:$0xff]  ;;  %s283_s0 = smov [#allocation5]  }
  0x12   :  { %v178_v10 = vld [vmem:[%s332_s3] ss:$0 sm:$0xff]  ;;  %s166_s29 = sshll.u32 %s283_s0, 4  ;;  %s167_s29 = int_to_ptr.vmem [resolvable:$true] %s166_s29 }
  0x13   :  { %v153_v12 = vld [vmem:[%s330_s1] sm:$0xff]  ;;  %s254_s3 = scalar_lea.vmem %s167_s29, 256  ;;  %p259_p6 = scmp.lt.s32.totalorder %s167_s29, %s167_s29 }
  0x14   :  { %200 = vmatpush3.bf16.msra.mxu0 %v226_v2  ;;  %p255_p5 = scmp.ne.s32.totalorder %s167_s29, %s254_s3  ;;  %p260_p7 = scmp.lt.s32.totalorder %s254_s3, %s254_s3 }
  0x15   :  { %201 = vmatprep.subr.bf16.mxu0 %v281_v0 }
  0x16   :  { %p261_p8 = por %p260_p7, %p259_p6 }
  0x18   :  { %202 = vmatpush3.bf16.msra.mxu0 %v227_v3  ;;  %p262_p9 = pnand %p261_p8, %p255_p5 }
  0x19   :  { %203 = vmatprep.subr.bf16.mxu0 %v281_v0 }
  0x1c   :  { %204 = vmatpush3.bf16.msra.mxu0 %v228_v4 }
  0x1d   :  { %205 = vmatprep.subr.bf16.mxu0 %v281_v0 }
  0x20   :  { %206 = vmatpush3.bf16.msra.mxu0 %v229_v5 }
  0x21   :  { %207 = vmatprep.subr.bf16.mxu0 %v281_v0 }
  0x24   :  { %208 = vmatpush3.bf16.msra.mxu0 %v230_v6 }
  0x25   :  { %209 = vmatprep.subr.bf16.mxu0 %v281_v0 }
  0x28   :  { %210 = vmatpush3.bf16.msra.mxu0 %v231_v7 }
  0x29   :  { %211 = vmatprep.subr.bf16.mxu0 %v281_v0 }
  0x2c   :  { %212 = vmatpush3.bf16.msra.mxu0 %v232_v8 }
  0x2f   :  { %214 = vmatmul.mubr.bf16.vlgmr.msra.gmra.mxu0 %v233_v9 }
  0xef   :  { %v146_v11 = vpop.f32.mrf.mxu0 }
  0xf0   :  { %v147_v13 = vadd.f32 %v178_v10, %v146_v11 }
  0xf1   :  { %v215_v14 = vpop.f32.mrf.mxu0 }
  0xf2   :  { %v155_v15 = vadd.f32 %v153_v12, %v147_v13 }
  0xf3   :  { %v149_v16 = vpop.f32.mrf.mxu0 }
  0xf4   :  { %v157_v18 = vmax.f32 %v155_v15, 0.0  ;;  %v150_v19 = vadd.f32 %v178_v10, %v149_v16 }
  0xf5   :  { %v216_v20 = vpop.f32.mrf.mxu0 }
  0xf6   :  { %159 = vst [vmem:[#allocation5] sm:$0xff] %v157_v18  ;;  %v156_v21 = vadd.f32 %v154_v17, %v150_v19 }
  0xf8   :  { %v158_v22 = vmax.f32 %v156_v21, 0.0 }
  0xfa   :  { %160 = vst [vmem:[#allocation5 + $0x8] sm:$0xff] %v158_v22 }
  0xfb   :  { %265 = shalt.err (!%p262_p9)
}
  0xfc   :  { %s284_s30 = smov 128   ;;  %s285_s5 = smov 8  }
  0xfd   :  { %172 = dma.vmem_to_hbm [thread:$0]  %s167_s29, 256, %s333_s4, [#allocation4], %s284_s30, %s284_s30, %s285_s5  }
  0xfe   :  { %276 = dma.done.wait [#allocation4], 256  }
  0xff   :  { %277 = vsyncadd [#allocation4], 4294967040 }
 0x100   :  { %176 = vsyncpa [#allocation3], 1 }
 0x101   :  { %177 = vsyncpa [#allocation4], 1 }

</bundles_post_ra>
